<compile_context>
chip_gen: v5e
topology: v5e:2x2
jax: 0.10.0
libtpu: 0.0.40
codegen_flags: <defaults>
</compile_context>

<pallas_src>
import numpy as np
import jax
import jax.numpy as jnp
from jax.experimental import pallas as pl
from jax.experimental.pallas import tpu as pltpu

# ------------------------- configuration -------------------------
NQUBITS = 4
DIM = 2 ** NQUBITS          # statevector dimension = 16
LAYERS = 1
N_CLASS = 2

B = 256                     # batch (demo size; tiled along the grid)
F_IN = 32                   # classical model input features
HIDDEN = 64                 # classical model hidden width
C_OUT = 16                  # classical_output_dim (inferred in the torch module)

TILE_B = 128                # batch tile (lane axis); multiple of 128 for dense stores


# ------------------------- Pallas kernel -------------------------
def hybrid_kernel(x_ref, w1_ref, wb2_ref, bb2_ref, bits_ref, m_ref, out_ref):
    # All data is transposed: batch lives on the lane axis (lane-dense vregs everywhere).
    #   x_ref  : (F_IN+1, TILE_B) bf16   last row is ones (bias column of w1 folded in)
    #   w1_ref : (HIDDEN, F_IN+1) bf16
    #   wb2_ref: (NQUBITS, HIDDEN) bf16  = (w2 @ wb)^T
    #   bb2_ref: (NQUBITS, 1) f32        = (b2 @ wb + bb)^T
    #   bits_ref: (DIM, NQUBITS) f32     bit q of basis state k (wire 0 = MSB)
    #   m_ref  : (DIM, DIM) f32          quadratic form (ansatz + Z_0 + classifier folded)
    #   out_ref: (1, TILE_B) f32         logits for this batch tile

    # --- frozen classical model, layer 1 (bias via augmented ones row): h^T = relu(W1a @ x_aug) ---
    h = jnp.maximum(
        jnp.dot(w1_ref[...], x_ref[...], preferred_element_type=jnp.float32), 0.0)   # (HIDDEN, TB) f32

    # --- classical layer 2 fused with bridge Linear: bf^T = (w2@wb)^T @ h + (b2@wb + bb)^T ---
    bf = jnp.dot(wb2_ref[...], h.astype(jnp.bfloat16),
                 preferred_element_type=jnp.float32) + bb2_ref[...]                   # (NQUBITS, TB)

    # --- RX angle embedding magnitudes: p[k, b] = prod_q (cos(a_q/2) if bit_q(k)==0 else sin(a_q/2)) ---
    half = 0.5 * bf
    c = jnp.cos(half)                                                                  # (NQUBITS, TB) f32
    s = jnp.sin(half)
    bits = bits_ref[...]                                                               # (DIM, NQUBITS)
    nbits = 1.0 - bits                                                                 # hoisted once
    p = nbits[:, 0:1] * c[0:1, :] + bits[:, 0:1] * s[0:1, :]                           # (DIM, TB)
    for q in range(1, NQUBITS):                                                        # static unroll
        p = p * (nbits[:, q:q + 1] * c[q:q + 1, :] + bits[:, q:q + 1] * s[q:q + 1, :])

    # --- ansatz unitary + <Z_0> + classifier, all folded into one quadratic form ---
    # out[b] = p_b^T M p_b   where M = A diag(zsg*wc) A^T + B diag(zsg*wc) B^T + bc*I
    mp = jnp.dot(m_ref[...], p, preferred_element_type=jnp.float32)                    # (DIM, TB)
    out_ref[...] = jnp.sum(mp * p, axis=0, keepdims=True)                              # (1, TB) lane-dense


def hybrid_forward(x, params, tile_b=TILE_B):
    n_b = x.shape[0]
    n_tiles = pl.cdiv(n_b, tile_b)
    b_pad = n_tiles * tile_b

    # layout plumbing in the wrapper: batch -> lane axis, bf16 for the MXU, ones row for the bias
    x_t = x.T.astype(jnp.bfloat16)                                     # (F_IN, B)
    if b_pad != n_b:
        x_t = jnp.pad(x_t, ((0, 0), (0, b_pad - n_b)))
    x_aug = jnp.concatenate([x_t, jnp.ones((1, b_pad), jnp.bfloat16)], axis=0)  # (F_IN+1, Bp)

    w1a = params["w1_aug"]        # (HIDDEN, F_IN+1) bf16
    wb2 = params["wb2_t"]         # (NQUBITS, HIDDEN) bf16
    bb2 = params["bb2_col"]       # (NQUBITS, 1) f32
    bits = params["bits_cols"]    # (DIM, NQUBITS) f32
    mq = params["m_quad"]         # (DIM, DIM) f32

    out = pl.pallas_call(
        hybrid_kernel,
        out_shape=jax.ShapeDtypeStruct((1, b_pad), jnp.float32),
        grid=(n_tiles,),
        in_specs=[
            pl.BlockSpec((F_IN + 1, tile_b), lambda i: (0, i)),   # x tiled along batch (lanes)
            pl.BlockSpec(w1a.shape, lambda i: (0, 0)),            # weights/constants resident
            pl.BlockSpec(wb2.shape, lambda i: (0, 0)),
            pl.BlockSpec(bb2.shape, lambda i: (0, 0)),
            pl.BlockSpec(bits.shape, lambda i: (0, 0)),
            pl.BlockSpec(mq.shape, lambda i: (0, 0)),
        ],
        out_specs=pl.BlockSpec((1, tile_b), lambda i: (0, i)),    # lane-dense output tile
        compiler_params=pltpu.CompilerParams(
            dimension_semantics=("parallel",)),                   # batch axis -> both TCs on v7x
    )(x_aug, w1a, wb2, bb2, bits, mq)
    return out[0, :n_b]                                           # squeeze -> (B,)


# ------------------------- glue: ansatz unitary & folded constants -------------------------
def build_ansatz_unitary(theta, nq, layers):
    """Per layer: RY(theta_q) on each wire, then a CNOT ring. Wire 0 = most significant bit."""
    dim = 2 ** nq
    eye2 = np.eye(2)

    def embed_1q(g, wire):
        m = np.eye(1)
        for q in range(nq):
            m = np.kron(m, g if q == wire else eye2)
        return m

    def cnot(control, target):
        m = np.zeros((dim, dim))
        for k in range(dim):
            j = k ^ (1 << (nq - 1 - target)) if (k >> (nq - 1 - control)) & 1 else k
            m[j, k] = 1.0
        return m

    theta = np.asarray(theta, dtype=np.float64).reshape(layers, nq)
    u = np.eye(dim)
    for l in range(layers):
        layer = np.eye(dim)
        for q in range(nq):
            a = theta[l, q]
            g = np.array([[np.cos(a / 2), -np.sin(a / 2)],
                          [np.sin(a / 2), np.cos(a / 2)]])
            layer = embed_1q(g, q) @ layer
        for q in range(nq):
            layer = cnot(q, (q + 1) % nq) @ layer
        u = layer @ u
    return u  # real-valued for RY+CNOT ansatz


def build_quantum_constants(nq):
    dim = 2 ** nq
    ks = np.arange(dim)
    bits = np.stack([(ks >> (nq - 1 - q)) & 1 for q in range(nq)], axis=1).astype(np.float64)  # (dim, nq)
    pop = bits.sum(axis=1).astype(np.int64) % 4
    sre = np.array([1.0, 0.0, -1.0, 0.0])[pop]          # Re[(-i)^pop]
    sim = np.array([0.0, -1.0, 0.0, 1.0])[pop]          # Im[(-i)^pop]
    zsg = np.where(((ks >> (nq - 1)) & 1) == 0, 1.0, -1.0)
    return bits, sre, sim, zsg


def build_quadratic_form(u, wc_scalar, bc_scalar, nq):
    """M such that  logit(p) = p^T M p  for the RX-embedded product-state magnitudes p (||p|| = 1)."""
    dim = 2 ** nq
    bits, sre, sim, zsg = build_quantum_constants(nq)
    ut = u.T                                            # psi_row = psi0_row @ U^T
    a_re = sre[:, None] * ut                            # A[k,j] = sre[k] * U[j,k]
    a_im = sim[:, None] * ut
    zw = zsg * wc_scalar
    m = (a_re * zw[None, :]) @ a_re.T + (a_im * zw[None, :]) @ a_im.T
    m = m + bc_scalar * np.eye(dim)                     # ||p||^2 == 1 absorbs the classifier bias
    return bits, m


# ------------------------- pure numpy reference (cross-check, f64, unfused) -------------------------
def reference_forward(x, p, u_complex):
    x = np.asarray(x, np.float64)
    h = np.maximum(x @ p["w1"] + p["b1"], 0.0)
    cf = h @ p["w2"] + p["b2"]
    bf = cf @ p["wb"] + p["bb"]
    zsg = np.where(((np.arange(DIM) >> (NQUBITS - 1)) & 1) == 0, 1.0, -1.0)
    outs = []
    for i in range(bf.shape[0]):
        psi = np.array([1.0 + 0.0j])
        for q in range(NQUBITS):
            a = bf[i, q]
            psi = np.kron(psi, np.array([np.cos(a / 2), -1j * np.sin(a / 2)]))
        psi = u_complex @ psi
        outs.append(np.real(np.sum(np.abs(psi) ** 2 * zsg)))
    q_out = np.array(outs)[:, None]
    logits = q_out * np.asarray(p["wc"], np.float64) + np.asarray(p["bc"], np.float64)
    return logits[:, 0]


# ------------------------- main -------------------------
if __name__ == "__main__":
    key = jax.random.PRNGKey(0)
    keys = jax.random.split(key, 10)

    # deterministic synthetic parameters (shapes follow the module's __init__)
    w1 = 0.1 * jax.random.normal(keys[0], (F_IN, HIDDEN), jnp.float32)
    b1 = 0.1 * jax.random.normal(keys[1], (1, HIDDEN), jnp.float32)
    w2 = 0.1 * jax.random.normal(keys[2], (HIDDEN, C_OUT), jnp.float32)
    b2 = 0.1 * jax.random.normal(keys[3], (1, C_OUT), jnp.float32)
    wb = 0.1 * jax.random.normal(keys[4], (C_OUT, NQUBITS), jnp.float32)   # bridge
    bb = 0.1 * jax.random.normal(keys[5], (1, NQUBITS), jnp.float32)
    theta = jax.random.normal(keys[6], (LAYERS * NQUBITS,), jnp.float32)   # quantum_params
    wc = jax.random.normal(keys[7], (1, 1), jnp.float32)                   # classifier (1 -> 1)
    bc = jax.random.normal(keys[8], (1, 1), jnp.float32)
    x = jax.random.normal(keys[9], (B, F_IN), jnp.float32)

    # ---- glue-time algebraic folding (all in float64, cast once) ----
    u = build_ansatz_unitary(np.asarray(theta), NQUBITS, LAYERS)
    w1_np, b1_np = np.asarray(w1, np.float64), np.asarray(b1, np.float64)
    w2_np, b2_np = np.asarray(w2, np.float64), np.asarray(b2, np.float64)
    wb_np, bb_np = np.asarray(wb, np.float64), np.asarray(bb, np.float64)
    wb2_np = w2_np @ wb_np                   # fused classical L2 + bridge  (HIDDEN, NQUBITS)
    bb2_np = b2_np @ wb_np + bb_np           # fused biases                 (1, NQUBITS)
    bits_np, m_np = build_quadratic_form(u, float(np.asarray(wc)[0, 0]),
                                         float(np.asarray(bc)[0, 0]), NQUBITS)

    params = dict(
        w1_aug=jnp.asarray(np.concatenate([w1_np.T, b1_np.T], axis=1), jnp.bfloat16),  # (HIDDEN, F_IN+1)
        wb2_t=jnp.asarray(wb2_np.T, jnp.bfloat16),                                     # (NQUBITS, HIDDEN)
        bb2_col=jnp.asarray(bb2_np.T, jnp.float32),                                    # (NQUBITS, 1)
        bits_cols=jnp.asarray(bits_np, jnp.float32),                                   # (DIM, NQUBITS)
        m_quad=jnp.asarray(m_np, jnp.float32),                                         # (DIM, DIM)
    )

    fwd = jax.jit(lambda xx: hybrid_forward(xx, params))
    logits = jax.block_until_ready(fwd(x))                                             # (B,)

    ref = reference_forward(np.asarray(x),
                            dict(w1=w1_np, b1=b1_np, w2=w2_np, b2=b2_np,
                                 wb=wb_np, bb=bb_np,
                                 wc=np.asarray(wc), bc=np.asarray(bc)),
                            u.astype(np.complex128))
    # tolerance loosened vs. the pure-f32 version: the classical MLP feeds bf16 into the MXU
    np.testing.assert_allclose(np.asarray(logits), ref, rtol=2e-2, atol=2e-2)

    print("KERNEL_OK")
</pallas_src>

<mosaic_0001>
module attributes {stable_mosaic.version = 11 : i64} {
  func.func @hybrid_kernel(%arg0: i32, %arg1: memref<33x128xbf16, #tpu.memory_space<vmem>>, %arg2: memref<64x33xbf16, #tpu.memory_space<vmem>>, %arg3: memref<4x64xbf16, #tpu.memory_space<vmem>>, %arg4: memref<4x1xf32, #tpu.memory_space<vmem>>, %arg5: memref<16x4xf32, #tpu.memory_space<vmem>>, %arg6: memref<16x16xf32, #tpu.memory_space<vmem>>, %arg7: memref<1x128xf32, #tpu.memory_space<vmem>>) attributes {dimension_semantics = [#tpu.dimension_semantics<parallel>], iteration_bounds = array<i64: 2>, scalar_prefetch = 0 : i64, scratch_operands = 0 : i64, tpu.core_type = #tpu.core_type<tc>, window_params = [{transform_indices = @transform_0, window_bounds = array<i64: 33, 128>}, {pipeline_mode = #tpu.pipeline_mode<synchronous>, transform_indices = @transform_1, window_bounds = array<i64: 64, 33>}, {pipeline_mode = #tpu.pipeline_mode<synchronous>, transform_indices = @transform_2, window_bounds = array<i64: 4, 64>}, {pipeline_mode = #tpu.pipeline_mode<synchronous>, transform_indices = @transform_3, window_bounds = array<i64: 4, 1>}, {pipeline_mode = #tpu.pipeline_mode<synchronous>, transform_indices = @transform_4, window_bounds = array<i64: 16, 4>}, {pipeline_mode = #tpu.pipeline_mode<synchronous>, transform_indices = @transform_5, window_bounds = array<i64: 16, 16>}, {transform_indices = @transform_6, window_bounds = array<i64: 1, 128>}]} {
    %c0 = arith.constant 0 : index
    %c0_0 = arith.constant 0 : index
    %0 = vector.load %arg2[%c0, %c0_0] : memref<64x33xbf16, #tpu.memory_space<vmem>>, vector<64x33xbf16>
    %c0_1 = arith.constant 0 : index
    %c0_2 = arith.constant 0 : index
    %1 = vector.load %arg1[%c0_1, %c0_2] : memref<33x128xbf16, #tpu.memory_space<vmem>>, vector<33x128xbf16>
    %cst = arith.constant dense<0.000000e+00> : vector<64x128xf32>
    %2 = tpu.matmul %0, %1, %cst {dimension_numbers = #tpu.dot_dimension_numbers<[1], [0], [0], [1], [0, 0, 1, 1], [], []>} : vector<64x33xbf16>, vector<33x128xbf16>, vector<64x128xf32> -> vector<64x128xf32>
    %cst_3 = arith.constant 0.000000e+00 : f32
    %3 = vector.broadcast %cst_3 : f32 to vector<64x128xf32>
    %4 = arith.maximumf %2, %3 : vector<64x128xf32>
    %c0_4 = arith.constant 0 : index
    %c0_5 = arith.constant 0 : index
    %5 = vector.load %arg3[%c0_4, %c0_5] : memref<4x64xbf16, #tpu.memory_space<vmem>>, vector<4x64xbf16>
    %6 = arith.truncf %4 : vector<64x128xf32> to vector<64x128xbf16>
    %cst_6 = arith.constant dense<0.000000e+00> : vector<4x128xf32>
    %7 = tpu.matmul %5, %6, %cst_6 {dimension_numbers = #tpu.dot_dimension_numbers<[1], [0], [0], [1], [0, 0, 1, 1], [], []>} : vector<4x64xbf16>, vector<64x128xbf16>, vector<4x128xf32> -> vector<4x128xf32>
    %c0_7 = arith.constant 0 : index
    %c0_8 = arith.constant 0 : index
    %8 = vector.load %arg4[%c0_7, %c0_8] : memref<4x1xf32, #tpu.memory_space<vmem>>, vector<4x1xf32>
    %9 = vector.broadcast %8 : vector<4x1xf32> to vector<4x128xf32>
    %10 = arith.addf %7, %9 : vector<4x128xf32>
    %cst_9 = arith.constant 5.000000e-01 : f32
    %11 = vector.broadcast %cst_9 : f32 to vector<4x128xf32>
    %12 = arith.mulf %11, %10 : vector<4x128xf32>
    %13 = math.cos %12 : vector<4x128xf32>
    %14 = math.sin %12 : vector<4x128xf32>
    %c0_10 = arith.constant 0 : index
    %c0_11 = arith.constant 0 : index
    %15 = vector.load %arg5[%c0_10, %c0_11] : memref<16x4xf32, #tpu.memory_space<vmem>>, vector<16x4xf32>
    %cst_12 = arith.constant 1.000000e+00 : f32
    %16 = vector.broadcast %cst_12 : f32 to vector<16x4xf32>
    %17 = arith.subf %16, %15 : vector<16x4xf32>
    %18 = vector.extract_strided_slice %17 {offsets = [0, 0], sizes = [16, 1], strides = [1, 1]} : vector<16x4xf32> to vector<16x1xf32>
    %19 = vector.extract_strided_slice %13 {offsets = [0, 0], sizes = [1, 128], strides = [1, 1]} : vector<4x128xf32> to vector<1x128xf32>
    %20 = vector.broadcast %18 : vector<16x1xf32> to vector<16x128xf32>
    %21 = vector.broadcast %19 : vector<1x128xf32> to vector<16x128xf32>
    %22 = arith.mulf %20, %21 : vector<16x128xf32>
    %23 = vector.extract_strided_slice %15 {offsets = [0, 0], sizes = [16, 1], strides = [1, 1]} : vector<16x4xf32> to vector<16x1xf32>
    %24 = vector.extract_strided_slice %14 {offsets = [0, 0], sizes = [1, 128], strides = [1, 1]} : vector<4x128xf32> to vector<1x128xf32>
    %25 = vector.broadcast %23 : vector<16x1xf32> to vector<16x128xf32>
    %26 = vector.broadcast %24 : vector<1x128xf32> to vector<16x128xf32>
    %27 = arith.mulf %25, %26 : vector<16x128xf32>
    %28 = arith.addf %22, %27 : vector<16x128xf32>
    %29 = vector.extract_strided_slice %17 {offsets = [0, 1], sizes = [16, 1], strides = [1, 1]} : vector<16x4xf32> to vector<16x1xf32>
    %30 = vector.extract_strided_slice %13 {offsets = [1, 0], sizes = [1, 128], strides = [1, 1]} : vector<4x128xf32> to vector<1x128xf32>
    %31 = vector.broadcast %29 : vector<16x1xf32> to vector<16x128xf32>
    %32 = vector.broadcast %30 : vector<1x128xf32> to vector<16x128xf32>
    %33 = arith.mulf %31, %32 : vector<16x128xf32>
    %34 = vector.extract_strided_slice %15 {offsets = [0, 1], sizes = [16, 1], strides = [1, 1]} : vector<16x4xf32> to vector<16x1xf32>
    %35 = vector.extract_strided_slice %14 {offsets = [1, 0], sizes = [1, 128], strides = [1, 1]} : vector<4x128xf32> to vector<1x128xf32>
    %36 = vector.broadcast %34 : vector<16x1xf32> to vector<16x128xf32>
    %37 = vector.broadcast %35 : vector<1x128xf32> to vector<16x128xf32>
    %38 = arith.mulf %36, %37 : vector<16x128xf32>
    %39 = arith.addf %33, %38 : vector<16x128xf32>
    %40 = arith.mulf %28, %39 : vector<16x128xf32>
    %41 = vector.extract_strided_slice %17 {offsets = [0, 2], sizes = [16, 1], strides = [1, 1]} : vector<16x4xf32> to vector<16x1xf32>
    %42 = vector.extract_strided_slice %13 {offsets = [2, 0], sizes = [1, 128], strides = [1, 1]} : vector<4x128xf32> to vector<1x128xf32>
    %43 = vector.broadcast %41 : vector<16x1xf32> to vector<16x128xf32>
    %44 = vector.broadcast %42 : vector<1x128xf32> to vector<16x128xf32>
    %45 = arith.mulf %43, %44 : vector<16x128xf32>
    %46 = vector.extract_strided_slice %15 {offsets = [0, 2], sizes = [16, 1], strides = [1, 1]} : vector<16x4xf32> to vector<16x1xf32>
    %47 = vector.extract_strided_slice %14 {offsets = [2, 0], sizes = [1, 128], strides = [1, 1]} : vector<4x128xf32> to vector<1x128xf32>
    %48 = vector.broadcast %46 : vector<16x1xf32> to vector<16x128xf32>
    %49 = vector.broadcast %47 : vector<1x128xf32> to vector<16x128xf32>
    %50 = arith.mulf %48, %49 : vector<16x128xf32>
    %51 = arith.addf %45, %50 : vector<16x128xf32>
    %52 = arith.mulf %40, %51 : vector<16x128xf32>
    %53 = vector.extract_strided_slice %17 {offsets = [0, 3], sizes = [16, 1], strides = [1, 1]} : vector<16x4xf32> to vector<16x1xf32>
    %54 = vector.extract_strided_slice %13 {offsets = [3, 0], sizes = [1, 128], strides = [1, 1]} : vector<4x128xf32> to vector<1x128xf32>
    %55 = vector.broadcast %53 : vector<16x1xf32> to vector<16x128xf32>
    %56 = vector.broadcast %54 : vector<1x128xf32> to vector<16x128xf32>
    %57 = arith.mulf %55, %56 : vector<16x128xf32>
    %58 = vector.extract_strided_slice %15 {offsets = [0, 3], sizes = [16, 1], strides = [1, 1]} : vector<16x4xf32> to vector<16x1xf32>
    %59 = vector.extract_strided_slice %14 {offsets = [3, 0], sizes = [1, 128], strides = [1, 1]} : vector<4x128xf32> to vector<1x128xf32>
    %60 = vector.broadcast %58 : vector<16x1xf32> to vector<16x128xf32>
    %61 = vector.broadcast %59 : vector<1x128xf32> to vector<16x128xf32>
    %62 = arith.mulf %60, %61 : vector<16x128xf32>
    %63 = arith.addf %57, %62 : vector<16x128xf32>
    %64 = arith.mulf %52, %63 : vector<16x128xf32>
    %c0_13 = arith.constant 0 : index
    %c0_14 = arith.constant 0 : index
    %65 = vector.load %arg6[%c0_13, %c0_14] : memref<16x16xf32, #tpu.memory_space<vmem>>, vector<16x16xf32>
    %cst_15 = arith.constant dense<0.000000e+00> : vector<16x128xf32>
    %66 = tpu.matmul %65, %64, %cst_15 {dimension_numbers = #tpu.dot_dimension_numbers<[1], [0], [0], [1], [0, 0, 1, 1], [], []>} : vector<16x16xf32>, vector<16x128xf32>, vector<16x128xf32> -> vector<16x128xf32>
    %67 = arith.mulf %66, %64 : vector<16x128xf32>
    %cst_16 = arith.constant dense<0.000000e+00> : vector<128xf32>
    %68 = vector.multi_reduction <add>, %67, %cst_16 [0] : vector<16x128xf32> to vector<128xf32>
    %69 = vector.shape_cast %68 : vector<128xf32> to vector<1x128xf32>
    %c0_17 = arith.constant 0 : index
    %c0_18 = arith.constant 0 : index
    %70 = vector.load %arg7[%c0_17, %c0_18] : memref<1x128xf32, #tpu.memory_space<vmem>>, vector<1x128xf32>
    tpu.vector_store %arg7[%c0_17, %c0_18], %69 {strides = array<i32>} : memref<1x128xf32, #tpu.memory_space<vmem>>, vector<1x128xf32>,
    return
  }
  func.func @transform_0(%arg0: i32) -> (i32, i32) {
    %c0_i32 = arith.constant 0 : i32
    %c0_i32_0 = arith.constant 0 : i32
    return %c0_i32, %arg0 : i32, i32
  }
  func.func @transform_1(%arg0: i32) -> (i32, i32) {
    %c0_i32 = arith.constant 0 : i32
    %c0_i32_0 = arith.constant 0 : i32
    %c0_i32_1 = arith.constant 0 : i32
    return %c0_i32, %c0_i32_0 : i32, i32
  }
  func.func @transform_2(%arg0: i32) -> (i32, i32) {
    %c0_i32 = arith.constant 0 : i32
    %c0_i32_0 = arith.constant 0 : i32
    %c0_i32_1 = arith.constant 0 : i32
    return %c0_i32, %c0_i32_0 : i32, i32
  }
  func.func @transform_3(%arg0: i32) -> (i32, i32) {
    %c0_i32 = arith.constant 0 : i32
    %c0_i32_0 = arith.constant 0 : i32
    %c0_i32_1 = arith.constant 0 : i32
    return %c0_i32, %c0_i32_0 : i32, i32
  }
  func.func @transform_4(%arg0: i32) -> (i32, i32) {
    %c0_i32 = arith.constant 0 : i32
    %c0_i32_0 = arith.constant 0 : i32
    %c0_i32_1 = arith.constant 0 : i32
    return %c0_i32, %c0_i32_0 : i32, i32
  }
  func.func @transform_5(%arg0: i32) -> (i32, i32) {
    %c0_i32 = arith.constant 0 : i32
    %c0_i32_0 = arith.constant 0 : i32
    %c0_i32_1 = arith.constant 0 : i32
    return %c0_i32, %c0_i32_0 : i32, i32
  }
  func.func @transform_6(%arg0: i32) -> (i32, i32) {
    %c0_i32 = arith.constant 0 : i32
    %c0_i32_0 = arith.constant 0 : i32
    return %c0_i32, %arg0 : i32, i32
  }
}

</mosaic_0001>

<bundles_post_ra>
// kernel: _lambda_.1
= control target key start
LH: loop header
LB: loop body
LE: loop exit
PB: predicated region body
PF: predicated region fallthrough
CT: control target
= control target key end

     0   :  { %11 = vsyncpa [#allocation4], 0  ;;  %s1403_s0 = inlined_call_operand.vmem [shape: bf16[33,256], index: 0, kind: input, shape index: {}]   ;;  %s1404_s1 = inlined_call_operand.vmem [shape: bf16[64,33], index: 1, kind: input, shape index: {}]   ;;  %s1405_s2 = inlined_call_operand.vmem [shape: bf16[4,64], index: 2, kind: input, shape index: {}]   ;;  %s1406_s3 = inlined_call_operand.vmem [shape: f32[4,1], index: 3, kind: input, shape index: {}]   ;;  %s1407_s4 = inlined_call_operand.vmem [shape: f32[16,4], index: 4, kind: input, shape index: {}]   ;;  %s1408_s5 = inlined_call_operand.vmem [shape: f32[16,16], index: 5, kind: input, shape index: {}]   ;;  %s1409_s6 = inlined_call_operand.hbm [shape: f32[1,256], index: 6, kind: output, shape index: {}]  }
   0x1   :  { %13 = vsyncpa [#allocation4 + $0x1], 0  ;;  %s1202_s21 = smov 0   ;;  %s1204_s22 = smov 0  }
   0x2   :  { %s1206_s23 = smov 0   ;;  %s1208_s24 = smov 0  }
   0x3 LB: > { %s976_s25 = sadd.s32 4294967295, %s1155_s24   ;;  %s977_s26 = sadd.s32 4294967294, %s1155_s24   ;;  %s1155_s24 = sphi %s1208_s24, %s1415_s24   ;;  %s1151_s23 = sphi %s1206_s23, %s1414_s23   ;;  %s1147_s22 = sphi %s1204_s22, %s1413_s22   ;;  %s1143_s21 = sphi %s1202_s21, %s1412_s21  }
   0x4   : > { %s1225_s27 = sadd.s32 1, %s1155_s24   ;;  %s26_s28 = sadd.s32 1, %s1151_s23 }
   0x5   : > { %s23_s29 = ssub.s32 %s1155_s24, %s1225_s27  ;;  %p33_p0 = scmp.ne.s32.totalorder %s1151_s23, %s1147_s22 }
   0x6   : > { %p24_p1 = scmp.eq.s32.totalorder %s23_s29, 0  ;;  %p34_p2 = scmp.eq.s32.totalorder %s1155_s24, 0 }
   0x7   : > { %p168_p3 = scmp.eq.s32.totalorder %s976_s25, 1  ;;  %p173_p4 = scmp.ne.s32.totalorder %s1147_s22, %s1143_s21 }
   0x8   : > { %s1238_s30 = scalar_select %p24_p1, %s1151_s23, %s26_s28  }
   0x9   : > { %p35_p5 = por %p34_p2, %p33_p0  ;;  %p1240_p6 = por %p168_p3, %p33_p0 }
   0xa   : > { %p174_p7 = scmp.eq.s32.totalorder %s977_s26, 1  ;;  %p979_p9 = scmp.ge.s32.totalorder %s1155_s24, 2 }
   0xc   : > { %p1244_p8 = por %p174_p7, %p173_p4  ;;  %205 = sbr.rel (%p979_p9) target bundleno = 27 (0x1b), region = 36 }
  0x11   : > { %208 = sbr.rel (!%p35_p5) target bundleno = 27 (0x1b), region = 40  ;;  %s210_s9 = sand.u32 (%p35_p5), 1, %s1151_s23  }
  0x12   : > { %s980_s10 = sshll.u32 (%p35_p5), %s1155_s24, 2  ;;  %s1030_s11 = smul.u32 (%p35_p5), 20, %s210_s9 }
  0x13   : > { %s214_s14 = scalar_lea.vmem (%p35_p5), %s1403_s0, %s980_s10 }
  0x14   : > { %v231_v0 = vld [vmem:[%s214_s14] sm:$0xf] (%p35_p5)  ;;  %v233_v1 = vld [vmem:[%s214_s14 + $0x8] sm:$0xf] (%p35_p5)  ;;  %v235_v2 = vld [vmem:[%s214_s14 + $0x10] sm:$0xf] (%p35_p5) }
  0x15   : > { %s212_s15 = scalar_lea.vmem (%p35_p5), [#allocation2], %s1030_s11  ;;  %v237_v3 = vld [vmem:[%s214_s14 + $0x18] sm:$0xf] (%p35_p5)  ;;  %v239_v4 = vld [vmem:[%s214_s14 + $0x20] sm:$0xf] (%p35_p5) }
  0x16   : > { %232 = vst [vmem:[%s212_s15] sm:$0xf] %v231_v0 }
  0x17   : > { %234 = vst [vmem:[%s212_s15 + $0x4] sm:$0xf] %v233_v1 }
  0x18   : > { %236 = vst [vmem:[%s212_s15 + $0x8] sm:$0xf] %v235_v2 }
  0x19   : > { %238 = vst [vmem:[%s212_s15 + $0xc] sm:$0xf] %v237_v3 }
  0x1a   : > { %240 = vst [vmem:[%s212_s15 + $0x10] sm:$0xf] %v239_v4 }
  0x1b PF: > { %p981_p10 = scmp.ge.s32.totalorder %s1155_s24, 1  ;;  %p273_p11 = scmp.lt.s32.totalorder %s1155_s24, 3 }
  0x1d   : > { %p274_p12 = pnand %p981_p10, %p273_p11 }
  0x1e   : > { %s1259_s16 = sand.u32 (!%p274_p12), 1, %s1147_s22   ;;  %s912_s12 = scalar_lea.hbm (!%p274_p12), %s1409_s6, %s976_s25 }
  0x1f   : > { %277 = sbr.rel (%p274_p12) target bundleno = 631 (0x277), region = 81  ;;  %s307_s13 = scalar_lea.vmem (!%p274_p12), [#allocation3], %s1259_s16 }
  0x20   : > { %s1031_s17 = smul.u32 (!%p274_p12), 20, %s1259_s16  ;;  %s914_s14 = sshll.u32 (!%p274_p12), %s307_s13, 4  ;;  %s915_s14 = int_to_ptr.vmem [resolvable:$true] %s914_s14 }
  0x21   : > { %s916_s15 = sshll.u32 (!%p274_p12), %s912_s12, 4  ;;  %s1113_s25 = scalar_lea.hbm (!%p274_p12), %s1409_s6, 2  ;;  %s917_s15 = int_to_ptr.hbm [resolvable:$true] %s916_s15 }
  0x22   : > { %s282_s18 = scalar_lea.vmem (!%p274_p12), [#allocation2], %s1031_s17  ;;  %s904_s17 = scalar_lea.sflag (!%p274_p12), [#allocation4], %s1259_s16 }
  0x24   : > { %v1157_v5 = vmov 0   ;;  %vm370_vm0 = vcmask 1040384   ;;  %v321_v6 = vld [vmem:[%s282_s18 + $0x10] sm:$0x1]  ;;  %v1026_v11 = vld [vmem:[%s282_s18 + $0x8] sm:$0xff]  ;;  %v1025_v12 = vld [vmem:[%s282_s18] sm:$0xff] }
  0x25   : > { %1081 = vset.pattern.permute.xlu0 %v1157_v5  ;;  %1082 = vset.pattern.permute.xlu1 %v1157_v5  ;;  %v351_v7 = vunpack.c.l.b16 %v321_v6  ;;  %v372_v8 = vsel %vm370_vm0, 65535, %v1157_v5  ;;  %v1023_v13 = vld [vmem:[%s1404_s1 + $0x10] sm:$0xff]  ;;  %v1021_v14 = vld [vmem:[%s1404_s1] sm:$0xff]  ;;  %vm357_vm1 = vcmask 269312   ;;  %v1024_v15 = vld [vmem:[%s1404_s1 + $0x18] sm:$0xff]  ;;  %v1158_v24 = vmov 1  }
  0x26   : > { %v1022_v16 = vld [vmem:[%s1404_s1 + $0x8] sm:$0xff]  ;;  %v418_v19 = vld [vmem:[%s1406_s3] sm:$0xf]  ;;  %1084 = vset.pattern.permute.xlu2 %v1158_v24  ;;  %v1159_v39 = vmov 2   ;;  %vm424_vm2 = vcmask 523264   ;;  %v1160_v45 = vmov 3  }
  0x27   : > { %v354_v9 = vpack.c.b16 %v351_v7, %v351_v7  ;;  %421 = vperm.xlu0 %1081, %v418_v19   ;;  %v752_v22 = vld [vmem:[%s1407_s4 + $0x8] sm:$0xff]  ;;  %v751_v27 = vld [vmem:[%s1407_s4] sm:$0xff]  ;;  %v1161_v62 = vmov 683565275   ;;  %v1162_v0 = vmov 2475754826  }
  0x28   : > { %v754_v23 = vsub.f32 1.0, %v752_v22  ;;  %775 = vperm.xlu1 %1082, %v752_v22   ;;  %799 = vperm.xlu2 %1084, %v752_v22   ;;  %v753_v28 = vsub.f32 1.0, %v751_v27  ;;  %v413_v44 = vld [vmem:[%s1405_s2] sm:$0x3]  ;;  %v1163_v3 = vmov 2131351028  }
  0x29   : > { %v374_v10 = vand.u32 %v372_v8, %v354_v9  ;;  %v1164_v7 = vmov 2102212464   ;;  %s1107_s18 = sshra.s32 %s917_s15, 4  ;;  %s1108_s18 = int_to_ptr.hbm [resolvable:$true] %s1107_s18 }
  0x2a   : > { %s1109_s19 = scalar_lea.hbm %s1108_s18, 1  ;;  %p1114_p2 = scmp.lt.s32.totalorder %s1108_s18, %s1409_s6 }
  0x2b   : > { %1027 = vmatpush.bf16.msra.mxu3 %v374_v10  ;;  %381 = vmatpush.bf16.msra.mxu0 %v374_v10  ;;  %v1165_v10 = vmov 920167782   ;;  %p1110_p13 = scmp.ne.s32.totalorder %s1108_s18, %s1109_s19  ;;  %p1115_p3 = scmp.lt.s32.totalorder %s1113_s25, %s1109_s19 }
  0x2d   : > { %p1111_p0 = pnand %p1110_p13, %p1240_p6  ;;  %p1116_p4 = por %p1115_p3, %p1114_p2 }
  0x2f   : > { %1028 = vmatpush.bf16.msra.mxu3 %v1026_v11  ;;  %382 = vmatpush.bf16.msra.mxu0 %v1026_v11  ;;  %p1112_p1 = pneg %p1111_p0 }
  0x30   : > { %762 = vperm.xlu0 %1081, %v754_v23   ;;  %1083 = vset.pattern.permute.xlu1 %v1158_v24 }
  0x31   : > { %788 = vperm.xlu1 %1083, %v754_v23   ;;  %1085 = vset.pattern.permute.xlu2 %v1157_v5  ;;  %p1117_p5 = pnand %p1116_p4, %p1112_p1 }
  0x32   : > { %757 = vperm.xlu2 %1085, %v753_v28  }
  0x33   : > { %1029 = vmatpush.bf16.msra.mxu3 %v1025_v12  ;;  %383 = vmatpush.bf16.msra.mxu0 %v1025_v12 }
  0x36   : > { %1008 = vmatmul.msk.bf16.vlgmr.msra.gmra.mxu3 %vm357_vm1, %v1023_v13  ;;  %1006 = vmatmul.msk.bf16.vlgmr.msra.gmra.mxu0 %vm357_vm1, %v1021_v14  ;;  %v1166_v13 = vmov 1326507024  }
  0x38   : > { %770 = vperm.xlu0 %1081, %v751_v27  }
  0x39   : > { %784 = vperm.xlu1 %1083, %v753_v28  }
  0x3a   : > { %1086 = vset.pattern.permute.xlu2 %v1158_v24 }
  0x3b   : > { %795 = vperm.xlu2 %1086, %v751_v27  }
  0x40   : > { %1087 = vset.pattern.permute.xlu0 %v1159_v39 }
  0x41   : > { %814 = vperm.xlu0 %1087, %v754_v23   ;;  %1088 = vset.pattern.permute.xlu1 %v1159_v39 }
  0x42   : > { %825 = vperm.xlu1 %1088, %v752_v22  }
  0x43   : > { %1089 = vset.pattern.permute.xlu2 %v1159_v39 }
  0x44   : > { %810 = vperm.xlu2 %1089, %v753_v28  }
  0x46   : > { %1009 = vmatmul.msk.bf16.gmra.mxu3 %vm357_vm1, %v1024_v15  ;;  %1007 = vmatmul.msk.bf16.gmra.mxu0 %vm357_vm1, %v1022_v16 }
  0x49   : > { %1091 = vset.pattern.permute.xlu0 %v1160_v45 }
  0x4a   : > { %821 = vperm.xlu1 %1088, %v751_v27   ;;  %851 = vperm.xlu0 %1091, %v752_v22  }
  0x4c   : > { %1090 = vset.pattern.permute.xlu2 %v1160_v45 }
  0x4d   : > { %840 = vperm.xlu2 %1090, %v754_v23  }
  0x52   : > { %1092 = vset.pattern.permute.xlu1 %v1160_v45 }
  0x53   : > { %836 = vperm.xlu1 %1092, %v753_v28  }
  0x55   : > { %847 = vperm.xlu2 %1090, %v751_v27  }
  0x99   : > { %v422_v46 = vpop.permute.xlu0 %421 }
  0xb3   : > { %v385_v17 = vpop.f32.mrf.mxu0 }
  0xb4   : > { %v405_v40 = vmax.f32 %v385_v17, 0.0 }
  0xb9   : > { %v395_v18 = vpop.f32.mrf.mxu3 }
  0xba   : > { %v409_v35 = vmax.f32 %v395_v18, 0.0 }
  0xbb   : > { %v387_v20 = vpop.f32.mrf.mxu0 }
  0xbc   : > { %v406_v41 = vmax.f32 %v387_v20, 0.0 }
  0xbe   : > { %v414_v43 = vpack.c.bf16 %v406_v41, %v405_v40 }
  0xc1   : > { %v397_v21 = vpop.f32.mrf.mxu3 }
  0xc2   : > { %v410_v32 = vmax.f32 %v397_v21, 0.0 }
  0xc3   : > { %v390_v26 = vpop.f32.mrf.mxu0 }
  0xc4   : > { %v407_v36 = vmax.f32 %v390_v26, 0.0  ;;  %v416_v38 = vpack.c.bf16 %v410_v32, %v409_v35 }
  0xc9   : > { %v400_v25 = vpop.f32.mrf.mxu3 }
  0xca   : > { %v411_v30 = vmax.f32 %v400_v25, 0.0 }
  0xcb   : > { %v392_v34 = vpop.f32.mrf.mxu0 }
  0xcc   : > { %v408_v37 = vmax.f32 %v392_v34, 0.0 }
  0xce   : > { %v415_v42 = vpack.c.bf16 %v408_v37, %v407_v36 }
  0xd1   : > { %v402_v29 = vpop.f32.mrf.mxu3 }
  0xd2   : > { %v412_v31 = vmax.f32 %v402_v29, 0.0 }
  0xd4   : > { %v417_v33 = vpack.c.bf16 %v412_v31, %v411_v30 }
  0xd6   : > { %432 = vmatpush.bf16.msra.mxu1 %v417_v33 }
  0xda   : > { %433 = vmatpush.bf16.msra.mxu1 %v416_v38 }
  0xde   : > { %434 = vmatpush.bf16.msra.mxu1 %v415_v42 }
  0xe2   : > { %435 = vmatpush.bf16.msra.mxu1 %v414_v43 }
  0xe5   : > { %1010 = vmatmul.msk.bf16.vlgmr.msra.gmra.mxu1 %vm424_vm2, %v413_v44 }
 0x162   : > { %v437_v47 = vpop.f32.mrf.mxu1 }
 0x163   : > { %v438_v48 = vadd.f32 %v437_v47, %v422_v46 }
 0x165   : > { %v1290_v49 = vmul.f32 0.5, %v438_v48 }
 0x167   : > { %v445_v50 = vand.u32 2139095040, %v1290_v49  ;;  %v442_v54 = vand.u32 2147483647, %v1290_v49  ;;  %vm444_vm15 = vcmp.lt.s32.totalorder %v1290_v49, 0 }
 0x169   : > { %v446_v51 = vshrl.u32 %v445_v50, 23  ;;  %v449_v56 = vand.u32 8388607, %v442_v54  ;;  %vm443_vm0 = vcmp.le.f32.partialorder %v442_v54, 0.7853982 }
 0x16a   : > { %v439_v52 = vpop.f32.mrf.mxu1 }
 0x16b   : > { %v1011_v53 = vadd.s32 4294967169, %v446_v51  ;;  %v450_v60 = vor.u32 8388608, %v449_v56 }
 0x16d   : > { %v452_v55 = vadd.s32 1, %v1011_v53  ;;  %v1307_v20 = vshll.u32 %v450_v60, 8 }
 0x16f   : > { %vm453_vm3 = vcmp.gt.s32.totalorder %v452_v55, 0  ;;  %v491_v29 = vand.u32 65535, %v1307_v20  ;;  %v492_v30 = vshrl.u32 %v1307_v20, 16 }
 0x170   : > { %v454_v57 = vsel %vm453_vm3, %v452_v55, 0 }
 0x171   : > { %v456_v58 = vand.u32 31, %v454_v57  ;;  %v1298_v61 = vshrl.u32 %v454_v57, 5 }
 0x173   : > { %v1296_v59 = vsub.s32 32, %v456_v58  ;;  %v459_v63 = vshll.u32 %v1161_v62, %v456_v58  ;;  %v462_v1 = vshll.u32 %v1162_v0, %v456_v58  ;;  %v465_v6 = vshll.u32 %v1163_v3, %v456_v58 }
 0x174   : > { %v468_v9 = vshll.u32 %v1164_v7, %v456_v58  ;;  %v471_v12 = vshll.u32 %v1165_v10, %v456_v58  ;;  %vm474_vm4 = vcmp.lt.s32.totalorder %v1298_v61, 1  ;;  %vm477_vm5 = vcmp.lt.s32.totalorder %v1298_v61, 4 }
 0x175   : > { %v460_v2 = vshrl.u32 %v1162_v0, %v1296_v59  ;;  %v463_v4 = vshrl.u32 %v1163_v3, %v1296_v59  ;;  %v466_v8 = vshrl.u32 %v1164_v7, %v1296_v59  ;;  %v469_v11 = vshrl.u32 %v1165_v10, %v1296_v59 }
 0x176   : > { %v472_v14 = vshrl.u32 %v1166_v13, %v1296_v59  ;;  %vm476_vm6 = vcmp.lt.s32.totalorder %v1298_v61, 3  ;;  %vm475_vm7 = vcmp.lt.s32.totalorder %v1298_v61, 2  ;;  %v458_v57 = vshrl.u32 %v1161_v62, %v1296_v59 }
 0x177   : > { %v461_v15 = vor.u32 %v460_v2, %v459_v63  ;;  %v464_v16 = vor.u32 %v463_v4, %v462_v1  ;;  %v467_v17 = vor.u32 %v466_v8, %v465_v6  ;;  %v470_v18 = vor.u32 %v469_v11, %v468_v9 }
 0x178   : > { %v473_v19 = vor.u32 %v472_v14, %v471_v12 }
 0x179   : > { %v482_v21 = vsel %vm474_vm4, %v461_v15, %v464_v16  ;;  %v486_v22 = vsel %vm474_vm4, %v464_v16, %v467_v17  ;;  %v483_v23 = vsel %vm477_vm5, %v470_v18, 920167782  ;;  %v479_v53 = vsel %vm477_vm5, %v467_v17, 2102212464 }
 0x17a   : > { %v487_v24 = vsel %vm477_vm5, %v473_v19, 1326507024  ;;  %v484_v25 = vsel %vm476_vm6, %v467_v17, %v483_v23  ;;  %v478_v2 = vsel %vm474_vm4, %v458_v57, %v461_v15  ;;  %v480_v3 = vsel %vm476_vm6, %v464_v16, %v479_v53  ;;  %v1347_v23 = vpop.permute.xlu2 %799 }
 0x17b   : > { %v488_v26 = vsel %vm476_vm6, %v470_v18, %v487_v24  ;;  %v485_v27 = vsel %vm475_vm7, %v482_v21, %v484_v25  ;;  %v481_v59 = vsel %vm475_vm7, %v478_v2, %v480_v3 }
 0x17c   : > { %v489_v28 = vsel %vm475_vm7, %v486_v22, %v488_v26  ;;  %v515_v33 = vand.u32 65535, %v485_v27  ;;  %v516_v34 = vshrl.u32 %v485_v27, 16  ;;  %v535_v11 = vmul.u32 %v1307_v20, %v481_v59  ;;  %v1345_v22 = vpop.permute.xlu1 %775 }
 0x17d   : > { %v493_v31 = vand.u32 65535, %v489_v28  ;;  %v494_v32 = vshrl.u32 %v489_v28, 16  ;;  %vm585_vm7 = vweird.f32 %v1290_v49 }
 0x17e   : > { %v518_v37 = vmul.u32 %v516_v34, %v491_v29  ;;  %v519_v38 = vmul.u32 %v515_v33, %v492_v30  ;;  %v517_v42 = vmul.u32 %v515_v33, %v491_v29  ;;  %v520_v46 = vmul.u32 %v516_v34, %v492_v30 }
 0x17f   : > { %v496_v35 = vmul.u32 %v494_v32, %v491_v29  ;;  %v497_v36 = vmul.u32 %v493_v31, %v492_v30  ;;  %v495_v39 = vmul.u32 %v493_v31, %v491_v29  ;;  %v498_v41 = vmul.u32 %v494_v32, %v492_v30 }
 0x180   : > { %v521_v43 = vshll.u32 %v518_v37, 16  ;;  %v523_v48 = vshll.u32 %v519_v38, 16  ;;  %v522_v0 = vshrl.u32 %v518_v37, 16  ;;  %v524_v7 = vshrl.u32 %v519_v38, 16 }
 0x181   : > { %v499_v40 = vshll.u32 %v496_v35, 16  ;;  %v501_v44 = vshll.u32 %v497_v36, 16  ;;  %v500_v58 = vshrl.u32 %v496_v35, 16  ;;  %v502_v4 = vshrl.u32 %v497_v36, 16 }
 0x182   : > { %vm525_vm9 = vc.u32 %v517_v42, %v521_v43  ;;  %v527_v50 = vadd.s32 %v521_v43, %v517_v42  ;;  %v1351_v33 = vpop.permute.xlu2 %757 }
 0x183   : > { %vm503_vm8 = vc.u32 %v495_v39, %v499_v40  ;;  %v505_v45 = vadd.s32 %v499_v40, %v495_v39  ;;  %v526_v52 = vsel %vm525_vm9, 1, %v1157_v5  ;;  %v763_v39 = vpop.permute.xlu0 %762 }
 0x184   : > { %v504_v47 = vsel %vm503_vm8, 1, %v1157_v5  ;;  %v528_v56 = vadd.s32 %v526_v52, %v520_v46  ;;  %vm529_vm11 = vc.u32 %v527_v50, %v523_v48  ;;  %v531_v10 = vadd.s32 %v527_v50, %v523_v48  ;;  %v1349_v32 = vpop.permute.xlu1 %788 }
 0x185   : > { %v506_v51 = vadd.s32 %v504_v47, %v498_v41  ;;  %vm507_vm10 = vc.u32 %v505_v45, %v501_v44  ;;  %v530_v63 = vsel %vm529_vm11, 1, %v1157_v5  ;;  %vm863_vm8 = vcmask 130048  }
 0x186   : > { %v508_v55 = vsel %vm507_vm10, 1, %v1157_v5  ;;  %v532_v1 = vadd.s32 %v530_v63, %v528_v56 }
 0x187   : > { %v510_v60 = vadd.s32 %v508_v55, %v506_v51 }
 0x188   : > { %v533_v8 = vadd.s32 %v532_v1, %v522_v0 }
 0x189   : > { %v511_v6 = vadd.s32 %v510_v60, %v500_v58 }
 0x18a   : > { %v534_v62 = vadd.s32 %v533_v8, %v524_v7  ;;  %v796_v42 = vpop.permute.xlu2 %795 }
 0x18b   : > { %v512_v9 = vadd.s32 %v511_v6, %v502_v4  ;;  %v771_v56 = vpop.permute.xlu0 %770 }
 0x18c   : > { %v538_v5 = vadd.s32 1, %v534_v62  ;;  %v785_v41 = vpop.permute.xlu1 %784 }
 0x18d   : > { %vm537_vm12 = vc.u32 %v512_v9, %v531_v10  ;;  %v536_v25 = vadd.s32 %v531_v10, %v512_v9 }
 0x18e   : > { %v539_v12 = vsel %vm537_vm12, %v538_v5, %v534_v62 }
 0x18f   : > { %v540_v13 = vadd.s32 %v539_v12, %v535_v11 }
 0x191   : > { %v541_v14 = vadd.s32 536870912, %v540_v13 }
 0x192   : > { %v811_v54 = vpop.permute.xlu2 %810 }
 0x193   : > { %v542_v15 = vshrl.u32 %v541_v14, 30  ;;  %v815_v9 = vpop.permute.xlu0 %814 }
 0x194   : > { %v826_v60 = vpop.permute.xlu1 %825 }
 0x195   : > { %v543_v17 = vshll.u32 %v542_v15, 30  ;;  %v566_v43 = vsub.s32 4, %v542_v15 }
 0x197   : > { %v544_v16 = vsub.s32 %v540_v13, %v543_v17  ;;  %v567_v48 = vsel %vm444_vm15, %v566_v43, %v542_v15 }
 0x198   : > { %v569_v52 = vsel %vm443_vm0, 0, %v567_v48 }
 0x199   : > { %vm545_vm13 = vcmp.lt.s32.totalorder %v544_v16, 0  ;;  %v546_v18 = vsub.s32 0, %v544_v16  ;;  %v740_v63 = vadd.s32 3, %v569_v52  ;;  %v586_v2 = vand.u32 3, %v569_v52 }
 0x19a   : > { %v841_v13 = vpop.permute.xlu2 %840 }
 0x19b   : > { %v547_v19 = vsel %vm545_vm13, %v546_v18, %v544_v16  ;;  %v741_v6 = vand.u32 3, %v740_v63  ;;  %vm587_vm1 = vcmp.lt.s32.totalorder %v586_v2, 2  ;;  %vm588_vm2 = vcmp.eq.s32.totalorder %v586_v2, 0  ;;  %v852_v43 = vpop.permute.xlu0 %851 }
 0x19c   : > { %v548_v21 = vclz %v547_v19  ;;  %vm591_vm3 = vcmp.eq.s32.totalorder %v586_v2, 2  ;;  %v822_v12 = vpop.permute.xlu1 %821 }
 0x19d   : > { %vm742_vm4 = vcmp.lt.s32.totalorder %v741_v6, 2  ;;  %vm743_vm5 = vcmp.eq.s32.totalorder %v741_v6, 0  ;;  %vm746_vm6 = vcmp.eq.s32.totalorder %v741_v6, 2 }
 0x19e   : > { %v1012_v61 = vadd.s32 4294967294, %v548_v21 }
 0x1a0   : > { %vm1013_vm14 = vcmp.lt.s32.totalorder %v1012_v61, 0 }
 0x1a1   : > { %v551_v24 = vsel %vm1013_vm14, 0, %v1012_v61 }
 0x1a2   : > { %v552_v26 = vsub.s32 32, %v551_v24  ;;  %v556_v20 = vsub.s32 4294967266, %v551_v24  ;;  %v553_v27 = vshll.u32 %v544_v16, %v551_v24 }
 0x1a4   : > { %v554_v28 = vshrl.u32 %v536_v25, %v552_v26  ;;  %v557_v29 = vadd.s32 127, %v556_v20 }
 0x1a6   : > { %v555_v30 = vor.u32 %v554_v28, %v553_v27  ;;  %v558_v31 = vshll.u32 %v557_v29, 23 }
 0x1a8   : > { %v559_v34 = vor.u32 4788187, %v558_v31  ;;  %v562_v36 = vcvt.s32.f32 %v555_v30 }
 0x1aa   : > { %v560_v35 = vand.u32 2147483647, %v559_v34 }
 0x1ac   : > { %v563_v37 = vmul.f32 %v562_v36, %v560_v35 }
 0x1ae   : > { %v564_v38 = vxor.u32 2147483648, %v563_v37 }
 0x1b0   : > { %v565_v40 = vsel %vm444_vm15, %v564_v38, %v563_v37 }
 0x1b1   : > { %v568_v44 = vsel %vm443_vm0, %v1290_v49, %v565_v40 }
 0x1b2   : > { %v570_v45 = vmul.f32 %v568_v44, %v568_v44 }
 0x1b4   : > { %v571_v46 = vmul.f32 -0.001358992, %v570_v45  ;;  %v578_v47 = vmul.f32 -0.00019511016, %v570_v45 }
 0x1b6   : > { %v572_v50 = vadd.f32 0.041655596, %v571_v46  ;;  %v579_v51 = vadd.f32 0.008332121, %v578_v47 }
 0x1b8   : > { %v573_v53 = vmul.f32 %v572_v50, %v570_v45  ;;  %v580_v55 = vmul.f32 %v579_v51, %v570_v45  ;;  %v848_v50 = vpop.permute.xlu2 %847 }
 0x1ba   : > { %v574_v57 = vadd.f32 -0.4999988, %v573_v53  ;;  %v581_v58 = vadd.f32 -0.16666654, %v580_v55 }
 0x1bc   : > { %v575_v0 = vmul.f32 %v574_v57, %v570_v45  ;;  %v582_v1 = vmul.f32 %v581_v58, %v570_v45 }
 0x1be   : > { %v576_v3 = vadd.f32 1.0, %v575_v0  ;;  %v583_v4 = vadd.f32 1.0, %v582_v1 }
 0x1c0   : > { %v584_v7 = vmul.f32 %v583_v4, %v568_v44  ;;  %v592_v8 = vxor.u32 2147483648, %v576_v3 }
 0x1c2   : > { %v589_v10 = vxor.u32 2147483648, %v584_v7  ;;  %v593_v62 = vsel %vm591_vm3, %v592_v8, %v584_v7  ;;  %v748_v11 = vsel %vm746_vm6, %v592_v8, %v584_v7 }
 0x1c4   : > { %v590_v59 = vsel %vm588_vm2, %v576_v3, %v589_v10  ;;  %v745_v5 = vsel %vm743_vm5, %v576_v3, %v589_v10 }
 0x1c5   : > { %v594_v14 = vsel %vm587_vm1, %v590_v59, %v593_v62  ;;  %v749_v15 = vsel %vm742_vm4, %v745_v5, %v748_v11 }
 0x1c6   : > { %v595_v17 = vsel %vm585_vm7, nan, %v594_v14  ;;  %v750_v16 = vsel %vm585_vm7, nan, %v749_v15 }
 0x1c7   : > { %v765_v18 = vperm.slane %v595_v17, 0  ;;  %v778_v19 = vperm.slane %v750_v16, 0  ;;  %v802_v21 = vperm.slane %v750_v16, 1  ;;  %v791_v61 = vperm.slane %v595_v17, 1 }
 0x1c8   : > { %v828_v24 = vperm.slane %v750_v16, 2  ;;  %v817_v25 = vperm.slane %v595_v17, 2  ;;  %v843_v26 = vperm.slane %v595_v17, 3  ;;  %v854_v20 = vperm.slane %v750_v16, 3 }
 0x1c9   : > { %v767_v27 = vmul.f32 %v765_v18, %v763_v39  ;;  %v780_v28 = vmul.f32 %v778_v19, %v1345_v22  ;;  %v804_v29 = vmul.f32 %v802_v21, %v1347_v23  ;;  %v793_v30 = vmul.f32 %v791_v61, %v1349_v32  ;;  %v837_v39 = vpop.permute.xlu1 %836 }
 0x1ca   : > { %v766_v49 = vmul.f32 %v765_v18, %v1351_v33  ;;  %v779_v31 = vmul.f32 %v778_v19, %v771_v56  ;;  %v792_v34 = vmul.f32 %v791_v61, %v785_v41  ;;  %v803_v35 = vmul.f32 %v802_v21, %v796_v42 }
 0x1cb   : > { %v782_v36 = vadd.f32 %v780_v28, %v767_v27  ;;  %v806_v37 = vadd.f32 %v804_v29, %v793_v30  ;;  %v830_v38 = vmul.f32 %v828_v24, %v826_v60  ;;  %v818_v40 = vmul.f32 %v817_v25, %v811_v54  ;;  %v861_v60 = vld [vmem:[%s1408_s5] sm:$0xff]  ;;  %v862_v54 = vld [vmem:[%s1408_s5 + $0x8] sm:$0xff] }
 0x1cc   : > { %v781_v44 = vadd.f32 %v779_v31, %v766_v49  ;;  %v805_v45 = vadd.f32 %v803_v35, %v792_v34  ;;  %v829_v46 = vmul.f32 %v828_v24, %v822_v12  ;;  %v845_v22 = vmul.f32 %v843_v26, %v841_v13 }
 0x1cd   : > { %v808_v47 = vmul.f32 %v806_v37, %v782_v36  ;;  %v819_v48 = vmul.f32 %v817_v25, %v815_v9  ;;  %v856_v32 = vmul.f32 %v854_v20, %v852_v43  ;;  %v855_v52 = vmul.f32 %v854_v20, %v848_v50 }
 0x1ce   : > { %v807_v23 = vmul.f32 %v805_v45, %v781_v44  ;;  %v831_v51 = vadd.f32 %v829_v46, %v818_v40  ;;  %v844_v41 = vmul.f32 %v843_v26, %v837_v39 }
 0x1cf   : > { %v832_v33 = vadd.f32 %v830_v38, %v819_v48  ;;  %v858_v42 = vadd.f32 %v856_v32, %v845_v22 }
 0x1d0   : > { %v833_v55 = vmul.f32 %v831_v51, %v807_v23  ;;  %v857_v56 = vadd.f32 %v855_v52, %v844_v41 }
 0x1d1   : > { %v834_v53 = vmul.f32 %v832_v33, %v808_v47 }
 0x1d2   : > { %v859_v58 = vmul.f32 %v857_v56, %v833_v55 }
 0x1d3   : > { %v860_v57 = vmul.f32 %v858_v42, %v834_v53 }
 0x1d5   : > { %884 = vmatpush.msra.mxu2 %v860_v57 }
 0x1d7   : > { %885 = vmatpush.msra.mxu2 %v859_v58 }
 0x1d8   : > { %1017 = vmatmul.msk.f32.vlgmr.msra.gmra.mxu2 %vm863_vm8, %v861_v60 }
 0x1e0   : > { %1018 = vmatmul.msk.f32.gmra.mxu2 %vm863_vm8, %v862_v54 }
 0x25b   : > { %v887_v63 = vpop.f32.mrf.mxu2 }
 0x25c   : > { %v893_v1 = vmul.f32 %v887_v63, %v859_v58 }
 0x263   : > { %v890_v0 = vpop.f32.mrf.mxu2 }
 0x264   : > { %v894_v2 = vmul.f32 %v890_v0, %v860_v57 }
 0x266   : > { %v895_v3 = vadd.f32 %v894_v2, %v893_v1 }
 0x268   : > { %v896_v4 = vrot.slane %v895_v3, 4 }
 0x26a   : > { %v897_v6 = vadd.f32 %v896_v4, %v895_v3 }
 0x26c   : > { %v898_v7 = vrot.slane %v897_v6, 2 }
 0x26e   : > { %v899_v8 = vadd.f32 %v898_v7, %v897_v6 }
 0x270   : > { %v900_v9 = vrot.slane %v899_v8, 1 }
 0x272   : > { %v901_v10 = vadd.f32 %v900_v9, %v899_v8 }
 0x274   : > { %902 = vst [vmem:[%s307_s13] sm:$0x1] %v901_v10 }
 0x275   : > { %1120 = shalt.err (!%p1117_p5)
}
 0x276   : > { %1032 = dma.vmem_to_hbm [thread:$0]  (%p1240_p6), %s915_s14, 16, %s917_s15, %s904_s17  }
 0x277 PF: > { %s928_s16 = sand.u32 1, %s1143_s21   ;;  %p1035_p7 = pnand %p979_p9, %p1244_p8 }
 0x278   : > { %s929_s9 = scalar_lea.sflag [#allocation4], %s928_s16 }
 0x279   : > { %p1036_p10 = pneg %p1035_p7 }
 0x27b   : > { %1138 = dma.done.wait (%p1036_p10), %s929_s9, 16  }
 0x27c   : > { %1140 = vsyncadd (%p1036_p10), %s929_s9, 4294967280  ;;  %p16_p11 = scmp.ge.s32.totalorder %s1225_s27, 4   ;;  %s1412_s21 = smov %s1147_s22 }
 0x27d   : > { %s1413_s22 = smov %s1151_s23  ;;  %s1414_s23 = smov %s1238_s30 }
 0x27e   : > { %s1415_s24 = smov %s1225_s27  ;;  %18 = sbr.rel (!%p16_p11) target bundleno = 3 (0x3), region = 125 }
 0x283   :  { %934 = vsyncpa [#allocation4], 1 }
 0x284   :  { %936 = vsyncpa [#allocation4 + $0x1], 1 }

</bundles_post_ra>
